<compile_context>
chip_gen: v5e
topology: v5e:2x2
jax: 0.10.0
libtpu: 0.0.40
codegen_flags: <defaults>
</compile_context>

<pallas_src>
import functools

import jax
import jax.numpy as jnp
from jax.experimental import pallas as pl
from jax.experimental.pallas import tpu as pltpu


def _round_up(n, m):
    return ((n + m - 1) // m) * m


def _choose_tile(batch, tile_b):
    """Pick a batch tile (multiple of 8) with low padding waste and, for larger
    batches, at least 2 grid steps so v7x can shard the 'parallel' axis."""
    bp8 = _round_up(batch, 8)
    tb = min(tile_b, bp8)
    if bp8 >= 256:  # big enough to split across 2 TensorCores (v7x); no-op on v5e/v6e
        tb = min(tb, _round_up(pl.cdiv(bp8, 2), 8))
    num_tiles = pl.cdiv(bp8, tb)
    tb = _round_up(pl.cdiv(bp8, num_tiles), 8)  # rebalance -> minimal padded rows
    return tb, num_tiles * tb


def _mlp_kernel(x_ref, w1_ref, b1_ref, w2_ref, b2_ref, *out_refs, with_q):
    if with_q:
        q_ref, act_ref = out_refs
    else:
        (act_ref,) = out_refs

    # Hidden layer: Linear + Tanh (f32 MXU, f32 accumulate, EUP tanh).
    h = jnp.dot(x_ref[...], w1_ref[...], preferred_element_type=jnp.float32)
    h = jnp.tanh(h + b1_ref[...])
    # Output layer: Linear. q is (tb, n_actions) -- compact, no padded lanes.
    q = jnp.dot(h, w2_ref[...], preferred_element_type=jnp.float32) + b2_ref[...]

    if with_q:
        q_ref[...] = q

    # Fused Network.act: per-row argmax, lowest-index tie-break (matches torch.argmax).
    n_act = q.shape[1]
    col = jax.lax.broadcasted_iota(jnp.int32, q.shape, 1)
    q_max = jnp.max(q, axis=1, keepdims=True)
    idx = jnp.where(q == q_max, col, n_act)
    act_ref[...] = jnp.min(idx, axis=1, keepdims=True).astype(jnp.int32)


def network_forward(x, w1, b1, w2, b2, *, tile_b=1024, return_q=True):
    """Pallas forward pass of Network: Linear -> Tanh -> Linear (+ fused argmax).

    x:  (B, in_features) float32
    w1: (in_features, 64) float32   (transposed torch weight)
    b1: (1, 64) float32
    w2: (64, n_actions) float32     (transposed torch weight)
    b2: (1, n_actions) float32
    returns: (q (B, n_actions) f32, actions (B,) i32) if return_q else actions (B,) i32
    """
    B, in_f = x.shape
    hidden = w1.shape[1]
    n_actions = w2.shape[1]

    tb, Bp = _choose_tile(B, tile_b)
    if Bp != B:
        # Row-only zero padding to a small multiple of 8 (no lane padding, no cast).
        x = jnp.pad(x, ((0, Bp - B), (0, 0)))
    grid = (Bp // tb,)

    in_specs = [
        pl.BlockSpec((tb, in_f), lambda i: (i, 0)),        # x tile (unpadded lanes)
        pl.BlockSpec((in_f, hidden), lambda i: (0, 0)),    # w1 (resident)
        pl.BlockSpec((1, hidden), lambda i: (0, 0)),       # b1
        pl.BlockSpec((hidden, n_actions), lambda i: (0, 0)),  # w2 (resident)
        pl.BlockSpec((1, n_actions), lambda i: (0, 0)),    # b2
    ]
    act_shape = jax.ShapeDtypeStruct((Bp, 1), jnp.int32)
    act_spec = pl.BlockSpec((tb, 1), lambda i: (i, 0))
    if return_q:
        out_shape = (jax.ShapeDtypeStruct((Bp, n_actions), jnp.float32), act_shape)
        out_specs = (pl.BlockSpec((tb, n_actions), lambda i: (i, 0)), act_spec)
    else:
        out_shape = act_shape
        out_specs = act_spec

    out = pl.pallas_call(
        functools.partial(_mlp_kernel, with_q=return_q),
        out_shape=out_shape,
        grid=grid,
        in_specs=in_specs,
        out_specs=out_specs,
        compiler_params=pltpu.CompilerParams(
            dimension_semantics=("parallel",)),            # shard batch across TCs
    )(x, w1, b1, w2, b2)

    if return_q:
        q_pad, act_pad = out
        return q_pad[:B], act_pad[:B, 0]
    return out[:B, 0]


def act(obs, w1, b1, w2, b2):
    """Mirror of Network.act: single observation -> int action (act-only kernel path)."""
    obs = jnp.asarray(obs, jnp.float32).reshape(1, -1)
    a = network_forward(obs, w1, b1, w2, b2, return_q=False)
    return int(a[0])


def init_params(key, in_features, hidden, n_actions):
    """Deterministic init mirroring nn.Linear default (uniform +/- 1/sqrt(fan_in))."""
    k1, k2, k3, k4 = jax.random.split(key, 4)
    lim1 = 1.0 / jnp.sqrt(jnp.float32(in_features))
    lim2 = 1.0 / jnp.sqrt(jnp.float32(hidden))
    w1 = jax.random.uniform(k1, (in_features, hidden), jnp.float32, -lim1, lim1)
    b1 = jax.random.uniform(k2, (1, hidden), jnp.float32, -lim1, lim1)
    w2 = jax.random.uniform(k3, (hidden, n_actions), jnp.float32, -lim2, lim2)
    b2 = jax.random.uniform(k4, (1, n_actions), jnp.float32, -lim2, lim2)
    return w1, b1, w2, b2


if __name__ == "__main__":
    # Walker2d-v4 observations are 17-dim; the module indexes env.action_space.n,
    # so we model a small discrete head (n_actions=6). Small batch of 2.
    # TODO(synk): gym env / replay-buffer training loop is host-side glue, not kernel work.
    B, IN_FEATURES, HIDDEN, N_ACTIONS = 2, 17, 64, 6

    key = jax.random.PRNGKey(0)
    k_x, k_p = jax.random.split(key)
    x = jax.random.normal(k_x, (B, IN_FEATURES), dtype=jnp.float32)
    w1, b1, w2, b2 = init_params(k_p, IN_FEATURES, HIDDEN, N_ACTIONS)

    q, actions = network_forward(x, w1, b1, w2, b2)
    q = jax.block_until_ready(q)
    actions = jax.block_until_ready(actions)

    # Full-f32 reference (highest precision for the XLA matmuls).
    hp = jax.lax.Precision.HIGHEST
    h_ref = jnp.tanh(jnp.dot(x, w1, precision=hp) + b1)
    ref = jnp.dot(h_ref, w2, precision=hp) + b2
    assert q.shape == (B, N_ACTIONS)
    assert actions.shape == (B,)
    assert jnp.allclose(q, ref, atol=1e-4, rtol=1e-4)

    # Fused Network.act agrees with argmax of the returned q-values.
    assert jnp.array_equal(actions, jnp.argmax(q, axis=1).astype(jnp.int32))

    # Act-only (rollout) path: no q writeback, same actions.
    actions_only = jax.block_until_ready(
        network_forward(x, w1, b1, w2, b2, return_q=False))
    assert jnp.array_equal(actions_only, actions)
    assert act(x[0], w1, b1, w2, b2) == int(actions[0])

    # Non-multiple-of-8 batch exercises the (cheap) row-padding path.
    x20 = jax.random.normal(jax.random.PRNGKey(1), (20, IN_FEATURES), jnp.float32)
    q20, a20 = network_forward(x20, w1, b1, w2, b2)
    q20 = jax.block_until_ready(q20)
    ref20 = jnp.dot(jnp.tanh(jnp.dot(x20, w1, precision=hp) + b1), w2, precision=hp) + b2
    assert q20.shape == (20, N_ACTIONS) and a20.shape == (20,)
    assert jnp.allclose(q20, ref20, atol=1e-4, rtol=1e-4)
    assert jnp.array_equal(a20, jnp.argmax(q20, axis=1).astype(jnp.int32))

    print("KERNEL_OK")
</pallas_src>

<mosaic_0001>
module attributes {stable_mosaic.version = 11 : i64} {
  func.func @_mlp_kernel(%arg0: i32, %arg1: memref<8x17xf32, #tpu.memory_space<vmem>>, %arg2: memref<17x64xf32, #tpu.memory_space<vmem>>, %arg3: memref<1x64xf32, #tpu.memory_space<vmem>>, %arg4: memref<64x6xf32, #tpu.memory_space<vmem>>, %arg5: memref<1x6xf32, #tpu.memory_space<vmem>>, %arg6: memref<8x6xf32, #tpu.memory_space<vmem>>, %arg7: memref<8x1xi32, #tpu.memory_space<vmem>>) attributes {dimension_semantics = [#tpu.dimension_semantics<parallel>], iteration_bounds = array<i64: 1>, scalar_prefetch = 0 : i64, scratch_operands = 0 : i64, tpu.core_type = #tpu.core_type<tc>, window_params = [{transform_indices = @transform_0, window_bounds = array<i64: 8, 17>}, {pipeline_mode = #tpu.pipeline_mode<synchronous>, transform_indices = @transform_1, window_bounds = array<i64: 17, 64>}, {pipeline_mode = #tpu.pipeline_mode<synchronous>, transform_indices = @transform_2, window_bounds = array<i64: 1, 64>}, {pipeline_mode = #tpu.pipeline_mode<synchronous>, transform_indices = @transform_3, window_bounds = array<i64: 64, 6>}, {pipeline_mode = #tpu.pipeline_mode<synchronous>, transform_indices = @transform_4, window_bounds = array<i64: 1, 6>}, {transform_indices = @transform_5, window_bounds = array<i64: 8, 6>}, {transform_indices = @transform_6, window_bounds = array<i64: 8, 1>}]} {
    %c0 = arith.constant 0 : index
    %c0_0 = arith.constant 0 : index
    %0 = vector.load %arg1[%c0, %c0_0] : memref<8x17xf32, #tpu.memory_space<vmem>>, vector<8x17xf32>
    %c0_1 = arith.constant 0 : index
    %c0_2 = arith.constant 0 : index
    %1 = vector.load %arg2[%c0_1, %c0_2] : memref<17x64xf32, #tpu.memory_space<vmem>>, vector<17x64xf32>
    %cst = arith.constant dense<0.000000e+00> : vector<8x64xf32>
    %2 = tpu.matmul %0, %1, %cst {dimension_numbers = #tpu.dot_dimension_numbers<[1], [0], [0], [1], [0, 0, 1, 1], [], []>} : vector<8x17xf32>, vector<17x64xf32>, vector<8x64xf32> -> vector<8x64xf32>
    %c0_3 = arith.constant 0 : index
    %c0_4 = arith.constant 0 : index
    %3 = vector.load %arg3[%c0_3, %c0_4] : memref<1x64xf32, #tpu.memory_space<vmem>>, vector<1x64xf32>
    %4 = vector.broadcast %3 : vector<1x64xf32> to vector<8x64xf32>
    %5 = arith.addf %2, %4 : vector<8x64xf32>
    %6 = math.tanh %5 : vector<8x64xf32>
    %c0_5 = arith.constant 0 : index
    %c0_6 = arith.constant 0 : index
    %7 = vector.load %arg4[%c0_5, %c0_6] : memref<64x6xf32, #tpu.memory_space<vmem>>, vector<64x6xf32>
    %cst_7 = arith.constant dense<0.000000e+00> : vector<8x6xf32>
    %8 = tpu.matmul %6, %7, %cst_7 {dimension_numbers = #tpu.dot_dimension_numbers<[1], [0], [0], [1], [0, 0, 1, 1], [], []>} : vector<8x64xf32>, vector<64x6xf32>, vector<8x6xf32> -> vector<8x6xf32>
    %c0_8 = arith.constant 0 : index
    %c0_9 = arith.constant 0 : index
    %9 = vector.load %arg5[%c0_8, %c0_9] : memref<1x6xf32, #tpu.memory_space<vmem>>, vector<1x6xf32>
    %10 = vector.broadcast %9 : vector<1x6xf32> to vector<8x6xf32>
    %11 = arith.addf %8, %10 : vector<8x6xf32>
    %c0_10 = arith.constant 0 : index
    %c0_11 = arith.constant 0 : index
    %12 = vector.load %arg6[%c0_10, %c0_11] : memref<8x6xf32, #tpu.memory_space<vmem>>, vector<8x6xf32>
    tpu.vector_store %arg6[%c0_10, %c0_11], %11 {strides = array<i32>} : memref<8x6xf32, #tpu.memory_space<vmem>>, vector<8x6xf32>,
    %13 = tpu.iota {dimensions = array<i32: 1>} : vector<8x6xi32>
    %cst_12 = arith.constant dense<0xFF800000> : vector<8xf32>
    %14 = vector.multi_reduction <maximumf>, %11, %cst_12 [1] : vector<8x6xf32> to vector<8xf32>
    %15 = vector.shape_cast %14 : vector<8xf32> to vector<8x1xf32>
    %16 = vector.broadcast %15 : vector<8x1xf32> to vector<8x6xf32>
    %17 = arith.cmpf oeq, %11, %16 : vector<8x6xf32>
    %c6_i32 = arith.constant 6 : i32
    %18 = vector.broadcast %c6_i32 : i32 to vector<8x6xi32>
    %19 = arith.select %17, %13, %18 : vector<8x6xi1>, vector<8x6xi32>
    %cst_13 = arith.constant dense<2147483647> : vector<8xi32>
    %20 = vector.multi_reduction <minsi>, %19, %cst_13 [1] : vector<8x6xi32> to vector<8xi32>
    %21 = vector.shape_cast %20 : vector<8xi32> to vector<8x1xi32>
    %c0_14 = arith.constant 0 : index
    %c0_15 = arith.constant 0 : index
    %22 = vector.load %arg7[%c0_14, %c0_15] : memref<8x1xi32, #tpu.memory_space<vmem>>, vector<8x1xi32>
    tpu.vector_store %arg7[%c0_14, %c0_15], %21 {strides = array<i32>} : memref<8x1xi32, #tpu.memory_space<vmem>>, vector<8x1xi32>,
    return
  }
  func.func @transform_0(%arg0: i32) -> (i32, i32) {
    %c0_i32 = arith.constant 0 : i32
    %c0_i32_0 = arith.constant 0 : i32
    return %arg0, %c0_i32 : i32, i32
  }
  func.func @transform_1(%arg0: i32) -> (i32, i32) {
    %c0_i32 = arith.constant 0 : i32
    %c0_i32_0 = arith.constant 0 : i32
    %c0_i32_1 = arith.constant 0 : i32
    return %c0_i32, %c0_i32_0 : i32, i32
  }
  func.func @transform_2(%arg0: i32) -> (i32, i32) {
    %c0_i32 = arith.constant 0 : i32
    %c0_i32_0 = arith.constant 0 : i32
    %c0_i32_1 = arith.constant 0 : i32
    return %c0_i32, %c0_i32_0 : i32, i32
  }
  func.func @transform_3(%arg0: i32) -> (i32, i32) {
    %c0_i32 = arith.constant 0 : i32
    %c0_i32_0 = arith.constant 0 : i32
    %c0_i32_1 = arith.constant 0 : i32
    return %c0_i32, %c0_i32_0 : i32, i32
  }
  func.func @transform_4(%arg0: i32) -> (i32, i32) {
    %c0_i32 = arith.constant 0 : i32
    %c0_i32_0 = arith.constant 0 : i32
    %c0_i32_1 = arith.constant 0 : i32
    return %c0_i32, %c0_i32_0 : i32, i32
  }
  func.func @transform_5(%arg0: i32) -> (i32, i32) {
    %c0_i32 = arith.constant 0 : i32
    %c0_i32_0 = arith.constant 0 : i32
    return %arg0, %c0_i32 : i32, i32
  }
  func.func @transform_6(%arg0: i32) -> (i32, i32) {
    %c0_i32 = arith.constant 0 : i32
    %c0_i32_0 = arith.constant 0 : i32
    return %arg0, %c0_i32 : i32, i32
  }
}

</mosaic_0001>

<bundles_post_ra>
// kernel: tpu_custom_call.1
= control target key start
LH: loop header
LB: loop body
LE: loop exit
PB: predicated region body
PF: predicated region fallthrough
CT: control target
= control target key end

     0   :  { %vm35_vm0 = vcmask 1040384   ;;  %vm31_vm1 = vcmask 138240   ;;  %s260_s0 = inlined_call_operand.vmem [shape: f32[8,17], index: 0, kind: input, shape index: {}]   ;;  %s261_s1 = inlined_call_operand.vmem [shape: f32[17,64], index: 1, kind: input, shape index: {}]   ;;  %s262_s2 = inlined_call_operand.vmem [shape: f32[1,64], index: 2, kind: input, shape index: {}]   ;;  %s263_s3 = inlined_call_operand.vmem [shape: f32[64,6], index: 3, kind: input, shape index: {}]   ;;  %s264_s4 = inlined_call_operand.vmem [shape: f32[1,6], index: 4, kind: input, shape index: {}]   ;;  %s265_s5 = inlined_call_operand.hbm [shape: f32[8,6], index: 5, kind: output, shape index: {0}]   ;;  %s266_s6 = inlined_call_operand.vmem [shape: s32[8,1], index: 6, kind: output, shape index: {1}]  }
   0x1   :  { %v26_v0 = vld [vmem:[%s261_s1 + $0x10] sm:$0x1]  ;;  %v25_v1 = vld [vmem:[%s261_s1 + $0x8] sm:$0xff]  ;;  %v67_v2 = vld [vmem:[%s263_s3 + $0x38] sm:$0xff] }
   0x2   :  { %142 = vmatpush.msk.msra.mxu0 %vm35_vm0, %v26_v0  ;;  %v66_v3 = vld [vmem:[%s263_s3 + $0x30] sm:$0xff]  ;;  %v24_v4 = vld [vmem:[%s261_s1] sm:$0xff]  ;;  %84 = vmatpush.msra.mxu1 %v67_v2  ;;  %v65_v6 = vld [vmem:[%s263_s3 + $0x28] sm:$0xff] }
   0x3   :  { %v23_v5 = vld [vmem:[%s260_s0] sm:$0xff] }
   0x4   :  { %53 = vmatpush.msra.mxu0 %v25_v1 }
   0x5   :  { %12 = vsyncpa [#allocation3], 0  ;;  %85 = vmatpush.msra.mxu1 %v66_v3  ;;  %v64_v7 = vld [vmem:[%s263_s3 + $0x20] sm:$0xff]  ;;  %v63_v8 = vld [vmem:[%s263_s3 + $0x18] sm:$0xff]  ;;  %vm72_vm2 = vcmask 523264   ;;  %vm96_vm3 = vcmask 48128   ;;  %v98_v20 = vlaneseq }
   0x6   :  { %54 = vmatpush.msra.mxu0 %v24_v4  ;;  %v62_v9 = vld [vmem:[%s263_s3 + $0x10] sm:$0xff]  ;;  %v61_v10 = vld [vmem:[%s263_s3 + $0x8] sm:$0xff]  ;;  %v60_v11 = vld [vmem:[%s263_s3] sm:$0xff]  ;;  %vm120_vm6 = vcmask 7168  }
   0x7   :  { %143 = vmatmul.msk.f32.vlgmr.msra.gmra.mxu0 %vm31_vm1, %v23_v5  ;;  %86 = vmatpush.msra.mxu1 %v65_v6  ;;  %v146_v12 = vld [vmem:[%s262_s2] ss:$0 sm:$0xff]  ;;  %v99_v21 = vand.u32 127, %v98_v20  ;;  %s176_s2 = smov [#allocation2]  }
   0x8   :  { %v147_v16 = vld [vmem:[%s264_s4] ss:$0 sm:$0xff]  ;;  %s127_s3 = sshll.u32 %s176_s2, 4  ;;  %s129_s4 = sshll.u32 %s265_s5, 4  ;;  %s128_s3 = int_to_ptr.vmem [resolvable:$true] %s127_s3  ;;  %s130_s4 = int_to_ptr.hbm [resolvable:$true] %s129_s4 }
   0x9   :  { %87 = vmatpush.msra.mxu1 %v64_v7 }
   0xb   :  { %88 = vmatpush.msra.mxu1 %v63_v8 }
   0xd   :  { %89 = vmatpush.msra.mxu1 %v62_v9 }
   0xf   :  { %90 = vmatpush.msra.mxu1 %v61_v10 }
  0x11   :  { %91 = vmatpush.msra.mxu1 %v60_v11 }
  0x84   :  { %v56_v13 = vpop.f32.mrf.mxu0 }
  0x85   :  { %v57_v14 = vadd.f32 %v146_v12, %v56_v13 }
  0x87   :  { %148 = vtanh.f32 %v57_v14 }
  0x8d   :  { %v149_v15 = vpop.eup %148 }
  0x8e   :  { %144 = vmatmul.msk.f32.vlgmr.msra.gmra.mxu1 %vm72_vm2, %v149_v15 }
 0x10b   :  { %v93_v17 = vpop.f32.mrf.mxu1 }
 0x10c   :  { %v94_v18 = vadd.f32 %v147_v16, %v93_v17 }
 0x10e   :  { %v100_v19 = vsel %vm96_vm3, %v94_v18, -inf  ;;  %97 = vst.msk [vmem:[#allocation2] sm:$0xff] %vm96_vm3, %v94_v18 }
 0x10f   :  { %101 = vmax.xlane.f32.xlu0 %v100_v19  ;;  %132 = dma.vmem_to_hbm [thread:$0]  %s128_s3, 128, %s130_s4, [#allocation3]  }
 0x182   :  { %v102_v22 = vpop.xlane.xlu0 %101 }
 0x183   :  { %vm103_vm4 = vcmp.eq.f32.partialorder %v94_v18, %v102_v22 }
 0x184   :  { %v104_v23 = vsel %vm103_vm4, %v99_v21, 6 }
 0x185   :  { %v105_v24 = vsel %vm96_vm3, %v104_v23, 2147483647 }
 0x186   :  { %v107_v25 = vshra.s32 %v105_v24, 16  ;;  %v106_v27 = vand.u32 65535, %v105_v24 }
 0x188   :  { %v109_v26 = vcvt.s32.f32 %v107_v25  ;;  %v108_v29 = vcvt.s32.f32 %v106_v27 }
 0x18a   :  { %110 = vmin.xlane.f32.xlu0 %v109_v26 }
 0x1fd   :  { %v111_v28 = vpop.xlane.xlu0 %110 }
 0x1fe   :  { %vm112_vm5 = vcmp.eq.f32.partialorder %v109_v26, %v111_v28  ;;  %v117_v31 = vcvt.f32.s32 %v111_v28 }
 0x1ff   :  { %v113_v30 = vsel %vm112_vm5, %v108_v29, inf }
 0x200   :  { %114 = vmin.xlane.f32.xlu1 %v113_v30  ;;  %v118_v33 = vshll.u32 %v117_v31, 16 }
 0x273   :  { %v115_v32 = vpop.xlane.xlu1 %114 }
 0x274   :  { %v116_v34 = vcvt.f32.s32 %v115_v32 }
 0x276   :  { %v119_v35 = vadd.s32 %v118_v33, %v116_v34 }
 0x278   :  { %121 = vst.msk [vmem:[%s266_s6] sm:$0xff] %vm120_vm6, %v119_v35 }
 0x279   :  { %174 = dma.done.wait [#allocation3], 128  }
 0x27a   :  { %175 = vsyncadd [#allocation3], 4294967168 }
 0x27b   :  { %141 = vsyncpa [#allocation3], 1 }

</bundles_post_ra>
